<compile_context>
chip_gen: v7x
topology: tpu7x:2x2x1
jax: 0.10.0
libtpu: 0.0.40
codegen_flags: <defaults>
</compile_context>

<pallas_src>
import functools

import jax
import jax.numpy as jnp
from jax import lax
from jax.experimental import pallas as pl
from jax.experimental.pallas import tpu as pltpu

IGNORE_INDEX = -100


def _masked_ce_kernel(preds_ref, gts_ref, out_ref, acc_ref, cnt_ref, *,
                      t_total, t_tile, ragged):
    """One (batch, time-tile) step of the masked-CE streaming reduction.

    preds_ref: (1, C, T_TILE)  logits, classes on sublanes, time on lanes
    gts_ref:   (1, 1, T_TILE)  int32 targets
    out_ref:   (1, 1, 128)     f32 per-batch result; lane 0 = ce sum, lane 1 = count
    acc_ref:   (1, T_TILE)     f32 scratch, per-lane partial ce sums (cross-tile)
    cnt_ref:   (1, T_TILE)     f32 scratch, per-lane partial valid counts (cross-tile)
    """
    ti = pl.program_id(1)

    @pl.when(ti == 0)
    def _init():
        acc_ref[...] = jnp.zeros_like(acc_ref)
        cnt_ref[...] = jnp.zeros_like(cnt_ref)

    x = preds_ref[0].astype(jnp.float32)          # (C, TT)
    g = gts_ref[0]                                # (1, TT) int32
    C, TT = x.shape

    # Numerically stable log-softmax over the class (sublane) axis.
    m = jnp.max(x, axis=0, keepdims=True)                                   # (1, TT)
    lse = m + jnp.log(jnp.sum(jnp.exp(x - m), axis=0, keepdims=True))       # (1, TT)

    # Gather the target-class logit via a one-hot compare against a class iota.
    cls = lax.broadcasted_iota(jnp.int32, (C, TT), 0)                       # (C, TT)
    tgt_logit = jnp.sum(jnp.where(cls == g, x, 0.0), axis=0, keepdims=True)  # (1, TT)
    # TODO(synk): out-of-range labels (other than -100) silently yield ce = lse instead
    # of erroring like PyTorch.
    ce = lse - tgt_logit                                                    # (1, TT)

    valid = g != IGNORE_INDEX                                               # (1, TT)
    if ragged:
        # Only needed when T is not a multiple of t_tile: mask padded lanes of the
        # last tile (their garbage logits/targets must not enter sum or count).
        t_local = lax.broadcasted_iota(jnp.int32, (1, TT), 1)
        valid = valid & ((ti * t_tile + t_local) < t_total)

    # NOTE: keep the jnp.where (not ce * valid) -- padded lanes may hold NaN/Inf and
    # NaN * 0 would poison the accumulator.
    acc_ref[...] += jnp.where(valid, ce, 0.0)
    cnt_ref[...] += valid.astype(jnp.float32)

    @pl.when(ti == pl.num_programs(1) - 1)
    def _finalize():
        s = jnp.sum(acc_ref[...])
        c = jnp.sum(cnt_ref[...])
        lane = lax.broadcasted_iota(jnp.int32, (1, 128), 1)
        out_ref[0] = jnp.where(lane == 0, s, jnp.where(lane == 1, c, 0.0))


def _vmem_capacity_bytes() -> int:
    try:
        return int(pltpu.get_tpu_info().vmem_capacity_bytes)
    except Exception:
        return 64 * 1024 * 1024  # conservative: v7x per-TensorCore VMEM


def _choose_t_tile(T: int, C: int, itemsize: int, vmem_cap: int) -> int:
    """Time tile: multiple of 128 (lane width) or == T, sized to a per-generation
    VMEM budget for the double-buffered logits stream."""
    if T <= 128:
        return T
    t_pad = ((T + 127) // 128) * 128
    # Budget ~1/4 of physical VMEM for the double-buffered preds tiles
    # (v5e/v6e: 32 MiB; v7x: 16 MiB), leaving plenty of headroom for gts/scratch/output.
    preds_budget = max(4 * 1024 * 1024, vmem_cap // 4)
    per_lane = 2 * C * itemsize                      # double-buffered bytes per time step
    t_cap = max(128, (preds_budget // per_lane) // 128 * 128)
    t_cap = min(t_cap, 32768)                        # keep lane-dense tiles reasonable
    return min(t_cap, t_pad)


def masked_ce_sum_count(preds: jax.Array, gts: jax.Array):
    """preds: (N, C, T) float (f32 or bf16), gts: (N, T) int ->
    (sum of CE over valid positions, valid count)."""
    N, C, T = preds.shape
    itemsize = jnp.dtype(preds.dtype).itemsize
    vmem_cap = _vmem_capacity_bytes()
    t_tile = _choose_t_tile(T, C, itemsize, vmem_cap)
    num_tiles = pl.cdiv(T, t_tile)
    ragged = (T % t_tile) != 0

    gts3 = gts.astype(jnp.int32).reshape(N, 1, T)    # lane-dense targets (cheap reshape)

    kernel = functools.partial(_masked_ce_kernel,
                               t_total=T, t_tile=t_tile, ragged=ragged)

    # Rough VMEM estimate: double-buffered preds + gts, two scratch rows, output block.
    est_vmem = (2 * C * t_tile * itemsize
                + 2 * t_tile * 4
                + 2 * t_tile * 4
                + 2 * 128 * 4)
    vmem_limit = int(min(vmem_cap * 3 // 4,
                         max(32 * 1024 * 1024, est_vmem + (8 << 20))))

    per_batch = pl.pallas_call(
        kernel,
        out_shape=jax.ShapeDtypeStruct((N, 1, 128), jnp.float32),
        grid=(N, num_tiles),
        in_specs=[
            pl.BlockSpec((1, C, t_tile), lambda n, t: (n, 0, t)),
            pl.BlockSpec((1, 1, t_tile), lambda n, t: (n, 0, t)),
        ],
        # Same block index across the time axis -> per-batch result block stays resident;
        # written once on the last time tile.
        out_specs=pl.BlockSpec((1, 1, 128), lambda n, t: (n, 0, 0)),
        scratch_shapes=[
            pltpu.VMEM((1, t_tile), jnp.float32),   # ce partial sums
            pltpu.VMEM((1, t_tile), jnp.float32),   # valid counts
        ],
        compiler_params=pltpu.CompilerParams(
            dimension_semantics=("parallel", "arbitrary"),
            vmem_limit_bytes=vmem_limit,
        ),
    )(preds, gts3)

    # Tiny (N, 2) host-side reduction.
    total_sum = jnp.sum(per_batch[:, 0, 0])
    total_cnt = jnp.sum(per_batch[:, 0, 1])
    return total_sum, total_cnt


def action_segmentation_loss(
    preds: jax.Array,             # (N, C, T) float (f32 or bf16)
    gts: jax.Array,               # (N, T) int
    sim_index: jax.Array = None,  # unused in default config (ce + focal only)
    *,
    ce: bool = True,
    focal: bool = True,
    ce_weight: float = 1.0,
    focal_weight: float = 1.0,
    gamma: float = 2.0,
    alpha: float = 0.25,
) -> jax.Array:
    N, C, T = preds.shape

    s, c = masked_ce_sum_count(preds, gts)
    # Note: if every position is ignored, c == 0 and this yields NaN -- same as
    # torch.nn.CrossEntropyLoss with reduction='mean'.
    ce_mean = s / c

    loss = jnp.float32(0.0)
    if ce:
        loss = loss + ce_weight * ce_mean
    if focal:
        # FocalLoss.forward: logpt = -CE_mean; pt = exp(logpt); logpt *= alpha;
        # loss = -(1-pt)**gamma * logpt; loss /= N (batch_average)
        logpt = -ce_mean
        pt = jnp.exp(logpt)
        logpt = logpt * alpha
        floss = -((1.0 - pt) ** gamma) * logpt
        floss = floss / N
        loss = loss + focal_weight * floss
    # TODO(synk): TMSE / GaussianSimilarityTMSE branches are disabled in the default
    # ActionSegmentationLoss config (tmse=False, gstmse=False) and are not implemented here.
    return loss


def _reference_loss(preds, gts, *, gamma=2.0, alpha=0.25):
    """Pure-JAX reference for the default (ce + focal) config."""
    N, C, T = preds.shape
    logp = jax.nn.log_softmax(preds.astype(jnp.float32), axis=1)
    valid = gts != IGNORE_INDEX
    g = jnp.where(valid, gts, 0).astype(jnp.int32)
    tgt_logp = jnp.take_along_axis(logp, g[:, None, :], axis=1)[:, 0, :]
    ce_per = -tgt_logp
    ce_mean = jnp.sum(jnp.where(valid, ce_per, 0.0)) / jnp.sum(valid)
    logpt = -ce_mean
    pt = jnp.exp(logpt)
    floss = -((1.0 - pt) ** gamma) * (alpha * logpt) / N
    return ce_mean + floss


if __name__ == "__main__":
    key = jax.random.PRNGKey(0)
    N, C, T = 2, 8, 16
    k1, k2 = jax.random.split(key)
    preds = jax.random.normal(k1, (N, C, T), dtype=jnp.float32)
    gts = jax.random.randint(k2, (N, T), 0, C, dtype=jnp.int32)
    # mark a few positions as ignored to exercise the ignore_index masking
    gts = gts.at[0, 3].set(IGNORE_INDEX)
    gts = gts.at[1, 10].set(IGNORE_INDEX)
    sim_index = jax.random.normal(key, (N, C, T), dtype=jnp.float32)  # unused (gstmse=False)

    loss = action_segmentation_loss(preds, gts, sim_index)
    jax.block_until_ready(loss)

    ref = _reference_loss(preds, gts)
    assert jnp.allclose(loss, ref, rtol=1e-5, atol=1e-5), (loss, ref)
    print("KERNEL_OK")
</pallas_src>

<mosaic_0001>
module attributes {stable_mosaic.version = 11 : i64} {
  func.func @_masked_ce_kernel(%arg0: i32, %arg1: i32, %arg2: memref<1x8x16xf32, #tpu.memory_space<vmem>>, %arg3: memref<1x1x16xi32, #tpu.memory_space<vmem>>, %arg4: memref<1x1x128xf32, #tpu.memory_space<vmem>>, %arg5: memref<1x16xf32, #tpu.memory_space<vmem>>, %arg6: memref<1x16xf32, #tpu.memory_space<vmem>>) attributes {dimension_semantics = [#tpu.dimension_semantics<parallel>, #tpu.dimension_semantics<arbitrary>], iteration_bounds = array<i64: 2, 1>, scalar_prefetch = 0 : i64, scratch_operands = 2 : i64, tpu.core_type = #tpu.core_type<tc>, window_params = [{transform_indices = @transform_0, window_bounds = array<i64: 1, 8, 16>}, {transform_indices = @transform_1, window_bounds = array<i64: 1, 1, 16>}, {transform_indices = @transform_2, window_bounds = array<i64: 1, 1, 128>}]} {
    %c0_i32 = arith.constant 0 : i32
    %0 = arith.cmpi eq, %arg1, %c0_i32 : i32
    %1 = arith.extui %0 : i1 to i32
    %c0_i32_0 = arith.constant 0 : i32
    %2 = arith.cmpi ne, %1, %c0_i32_0 : i32
    scf.if %2 {
      %cst_20 = arith.constant 0.000000e+00 : f32
      %39 = vector.broadcast %cst_20 : f32 to vector<1x16xf32>
      %c0_21 = arith.constant 0 : index
      %c0_22 = arith.constant 0 : index
      %40 = vector.load %arg5[%c0_21, %c0_22] : memref<1x16xf32, #tpu.memory_space<vmem>>, vector<1x16xf32>
      tpu.vector_store %arg5[%c0_21, %c0_22], %39 {strides = array<i32>} : memref<1x16xf32, #tpu.memory_space<vmem>>, vector<1x16xf32>,
      %cst_23 = arith.constant 0.000000e+00 : f32
      %41 = vector.broadcast %cst_23 : f32 to vector<1x16xf32>
      %c0_24 = arith.constant 0 : index
      %c0_25 = arith.constant 0 : index
      %42 = vector.load %arg6[%c0_24, %c0_25] : memref<1x16xf32, #tpu.memory_space<vmem>>, vector<1x16xf32>
      tpu.vector_store %arg6[%c0_24, %c0_25], %41 {strides = array<i32>} : memref<1x16xf32, #tpu.memory_space<vmem>>, vector<1x16xf32>,
    } else {
    }
    %c0 = arith.constant 0 : index
    %c0_1 = arith.constant 0 : index
    %c0_2 = arith.constant 0 : index
    %3 = vector.load %arg2[%c0, %c0_1, %c0_2] : memref<1x8x16xf32, #tpu.memory_space<vmem>>, vector<1x8x16xf32>
    %4 = vector.shape_cast %3 : vector<1x8x16xf32> to vector<8x16xf32>
    %c0_3 = arith.constant 0 : index
    %c0_4 = arith.constant 0 : index
    %c0_5 = arith.constant 0 : index
    %5 = vector.load %arg3[%c0_3, %c0_4, %c0_5] : memref<1x1x16xi32, #tpu.memory_space<vmem>>, vector<1x1x16xi32>
    %6 = vector.shape_cast %5 : vector<1x1x16xi32> to vector<1x16xi32>
    %cst = arith.constant dense<0xFF800000> : vector<16xf32>
    %7 = vector.multi_reduction <maximumf>, %4, %cst [0] : vector<8x16xf32> to vector<16xf32>
    %8 = vector.shape_cast %7 : vector<16xf32> to vector<1x16xf32>
    %9 = vector.broadcast %8 : vector<1x16xf32> to vector<8x16xf32>
    %10 = arith.subf %4, %9 : vector<8x16xf32>
    %11 = math.exp %10 : vector<8x16xf32>
    %cst_6 = arith.constant dense<0.000000e+00> : vector<16xf32>
    %12 = vector.multi_reduction <add>, %11, %cst_6 [0] : vector<8x16xf32> to vector<16xf32>
    %13 = vector.shape_cast %12 : vector<16xf32> to vector<1x16xf32>
    %14 = math.log %13 : vector<1x16xf32>
    %15 = arith.addf %8, %14 : vector<1x16xf32>
    %16 = tpu.iota {dimensions = array<i32: 0>} : vector<8x16xi32>
    %17 = vector.broadcast %6 : vector<1x16xi32> to vector<8x16xi32>
    %18 = arith.cmpi eq, %16, %17 : vector<8x16xi32>
    %cst_7 = arith.constant 0.000000e+00 : f32
    %19 = vector.broadcast %cst_7 : f32 to vector<8x16xf32>
    %20 = arith.select %18, %4, %19 : vector<8x16xi1>, vector<8x16xf32>
    %cst_8 = arith.constant dense<0.000000e+00> : vector<16xf32>
    %21 = vector.multi_reduction <add>, %20, %cst_8 [0] : vector<8x16xf32> to vector<16xf32>
    %22 = vector.shape_cast %21 : vector<16xf32> to vector<1x16xf32>
    %23 = arith.subf %15, %22 : vector<1x16xf32>
    %c-100_i32 = arith.constant -100 : i32
    %24 = vector.broadcast %c-100_i32 : i32 to vector<1x16xi32>
    %25 = arith.cmpi ne, %6, %24 : vector<1x16xi32>
    %c0_9 = arith.constant 0 : index
    %c0_10 = arith.constant 0 : index
    %26 = vector.load %arg5[%c0_9, %c0_10] : memref<1x16xf32, #tpu.memory_space<vmem>>, vector<1x16xf32>
    %cst_11 = arith.constant 0.000000e+00 : f32
    %27 = vector.broadcast %cst_11 : f32 to vector<1x16xf32>
    %28 = arith.select %25, %23, %27 : vector<1x16xi1>, vector<1x16xf32>
    %29 = arith.addf %26, %28 : vector<1x16xf32>
    %c0_12 = arith.constant 0 : index
    %c0_13 = arith.constant 0 : index
    %30 = vector.load %arg5[%c0_12, %c0_13] : memref<1x16xf32, #tpu.memory_space<vmem>>, vector<1x16xf32>
    tpu.vector_store %arg5[%c0_12, %c0_13], %29 {strides = array<i32>} : memref<1x16xf32, #tpu.memory_space<vmem>>, vector<1x16xf32>,
    %c0_14 = arith.constant 0 : index
    %c0_15 = arith.constant 0 : index
    %31 = vector.load %arg6[%c0_14, %c0_15] : memref<1x16xf32, #tpu.memory_space<vmem>>, vector<1x16xf32>
    %32 = arith.extui %25 : vector<1x16xi1> to vector<1x16xi32>
    %33 = arith.sitofp %32 : vector<1x16xi32> to vector<1x16xf32>
    %34 = arith.addf %31, %33 : vector<1x16xf32>
    %c0_16 = arith.constant 0 : index
    %c0_17 = arith.constant 0 : index
    %35 = vector.load %arg6[%c0_16, %c0_17] : memref<1x16xf32, #tpu.memory_space<vmem>>, vector<1x16xf32>
    tpu.vector_store %arg6[%c0_16, %c0_17], %34 {strides = array<i32>} : memref<1x16xf32, #tpu.memory_space<vmem>>, vector<1x16xf32>,
    %c0_i32_18 = arith.constant 0 : i32
    %36 = arith.cmpi eq, %arg1, %c0_i32_18 : i32
    %37 = arith.extui %36 : i1 to i32
    %c0_i32_19 = arith.constant 0 : i32
    %38 = arith.cmpi ne, %37, %c0_i32_19 : i32
    scf.if %38 {
      %c0_20 = arith.constant 0 : index
      %c0_21 = arith.constant 0 : index
      %39 = vector.load %arg5[%c0_20, %c0_21] : memref<1x16xf32, #tpu.memory_space<vmem>>, vector<1x16xf32>
      %40 = vector.shape_cast %39 : vector<1x16xf32> to vector<1x1x16xf32>
      %cst_22 = arith.constant dense<0.000000e+00> : vector<1xf32>
      %41 = vector.multi_reduction <add>, %40, %cst_22 [1, 2] : vector<1x1x16xf32> to vector<1xf32>
      %42 = vector.shape_cast %41 : vector<1xf32> to vector<1x1x1xf32>
      %43 = vector.extract %42[0, 0, 0] : f32 from vector<1x1x1xf32>
      %c0_23 = arith.constant 0 : index
      %c0_24 = arith.constant 0 : index
      %44 = vector.load %arg6[%c0_23, %c0_24] : memref<1x16xf32, #tpu.memory_space<vmem>>, vector<1x16xf32>
      %45 = vector.shape_cast %44 : vector<1x16xf32> to vector<1x1x16xf32>
      %cst_25 = arith.constant dense<0.000000e+00> : vector<1xf32>
      %46 = vector.multi_reduction <add>, %45, %cst_25 [1, 2] : vector<1x1x16xf32> to vector<1xf32>
      %47 = vector.shape_cast %46 : vector<1xf32> to vector<1x1x1xf32>
      %48 = vector.extract %47[0, 0, 0] : f32 from vector<1x1x1xf32>
      %49 = tpu.iota {dimensions = array<i32: 1>} : vector<1x128xi32>
      %c0_i32_26 = arith.constant 0 : i32
      %50 = vector.broadcast %c0_i32_26 : i32 to vector<1x128xi32>
      %51 = arith.cmpi eq, %49, %50 : vector<1x128xi32>
      %c1_i32 = arith.constant 1 : i32
      %52 = vector.broadcast %c1_i32 : i32 to vector<1x128xi32>
      %53 = arith.cmpi eq, %49, %52 : vector<1x128xi32>
      %cst_27 = arith.constant 0.000000e+00 : f32
      %54 = vector.broadcast %48 : f32 to vector<1x128xf32>
      %55 = vector.broadcast %cst_27 : f32 to vector<1x128xf32>
      %56 = arith.select %53, %54, %55 : vector<1x128xi1>, vector<1x128xf32>
      %57 = vector.broadcast %43 : f32 to vector<1x128xf32>
      %58 = arith.select %51, %57, %56 : vector<1x128xi1>, vector<1x128xf32>
      %c0_28 = arith.constant 0 : index
      %c0_29 = arith.constant 0 : index
      %c0_30 = arith.constant 0 : index
      %59 = vector.load %arg4[%c0_28, %c0_29, %c0_30] : memref<1x1x128xf32, #tpu.memory_space<vmem>>, vector<1x1x128xf32>
      %60 = vector.shape_cast %59 : vector<1x1x128xf32> to vector<1x128xf32>
      %61 = vector.shape_cast %58 : vector<1x128xf32> to vector<1x1x128xf32>
      tpu.vector_store %arg4[%c0_28, %c0_29, %c0_30], %61 {strides = array<i32>} : memref<1x1x128xf32, #tpu.memory_space<vmem>>, vector<1x1x128xf32>,
    } else {
    }
    return
  }
  func.func @transform_0(%arg0: i32, %arg1: i32) -> (i32, i32, i32) {
    %c0_i32 = arith.constant 0 : i32
    %c0_i32_0 = arith.constant 0 : i32
    return %arg0, %c0_i32, %arg1 : i32, i32, i32
  }
  func.func @transform_1(%arg0: i32, %arg1: i32) -> (i32, i32, i32) {
    %c0_i32 = arith.constant 0 : i32
    %c0_i32_0 = arith.constant 0 : i32
    return %arg0, %c0_i32, %arg1 : i32, i32, i32
  }
  func.func @transform_2(%arg0: i32, %arg1: i32) -> (i32, i32, i32) {
    %c0_i32 = arith.constant 0 : i32
    %c0_i32_0 = arith.constant 0 : i32
    %c0_i32_1 = arith.constant 0 : i32
    return %arg0, %c0_i32, %c0_i32_0 : i32, i32, i32
  }
}

</mosaic_0001>

<bundles_post_ra>
// kernel: tpu_custom_call.1
= control target key start
LH: loop header
LB: loop body
LE: loop exit
PB: predicated region body
PF: predicated region fallthrough
CT: control target
= control target key end

     0   :  { %7 = vsyncpa [#allocation5], 0  ;;  %s793_s0 = inlined_call_operand.hbm [shape: f32[2,8,16], index: 0, kind: input, shape index: {}]   ;;  %s794_s1 = inlined_call_operand.vmem [shape: s32[2,1,16], index: 1, kind: input, shape index: {}]   ;;  %s795_s2 = inlined_call_operand.hbm [shape: f32[2,1,128], index: 2, kind: output, shape index: {}]  }
   0x1   :  { %9 = vsyncpa [#allocation5 + $0x1], 0 }
   0x2   :  { %10 = vsyncpa [#allocation6], 0 }
   0x3   :  { %12 = vsyncpa [#allocation6 + $0x1], 0  ;;  %s604_s9 = smov 0   ;;  %s606_s10 = smov 0  }
   0x4   :  { %s608_s11 = smov 0   ;;  %s610_s12 = smov 0  }
   0x5   :  { %s612_s13 = smov 0   ;;  %s614_s14 = smov 0  }
   0x6 LB: > { %s389_s15 = sadd.s32 4294967295, %s584_s14   ;;  %s390_s16 = sadd.s32 4294967294, %s584_s14   ;;  %s584_s14 = sphi %s614_s14, %s18_s14   ;;  %s580_s13 = sphi %s612_s13, %s811_s13   ;;  %s576_s12 = sphi %s610_s12, %s810_s12   ;;  %s572_s11 = sphi %s608_s11, %s809_s11   ;;  %s568_s10 = sphi %s606_s10, %s808_s10   ;;  %s564_s9 = sphi %s604_s9, %s807_s9  }
   0x7   : > { %s30_s17 = sadd.s32 1, %s580_s13  ;;  %s39_s18 = sadd.s32 1, %s572_s11 }
   0x8   : > { %p32_p0 = scmp.ge.s32.totalorder %s30_s17, 2  ;;  %p46_p1 = scmp.ne.s32.totalorder %s572_s11, %s568_s10 }
   0x9   : > { %p47_p2 = scmp.eq.s32.totalorder %s584_s14, 0  ;;  %p52_p3 = scmp.ne.s32.totalorder %s568_s10, %s564_s9 }
   0xa   : > { %s813_s17 = smov (%p32_p0, %s30_s17), 0  ;;  %p53_p5 = scmp.eq.s32.totalorder %s389_s15, 0 }
   0xb   : > { %p645_p4 = por %p47_p2, %p46_p1  ;;  %s34_s20 = ssub.s32 %s580_s13, %s813_s17 }
   0xc   : > { %p104_p6 = scmp.eq.s32.totalorder %s389_s15, 1  ;;  %p37_p7 = scmp.eq.s32.totalorder %s34_s20, 0 }
   0xd   : > { %p651_p8 = por %p53_p5, %p52_p3  ;;  %p110_p10 = scmp.eq.s32.totalorder %s390_s16, 1 }
   0xe   : > { %p655_p9 = por %p104_p6, %p46_p1  ;;  %p417_p13 = scmp.lt.s32.totalorder %s584_s14, 2 }
   0xf   : > { %s660_s23 = scalar_select %p37_p7, %s572_s11, %s39_s18  }
  0x10   : > { %s799_s22 = scalar_select %p655_p9, 1, 0 }
  0x11   : > { %p662_p11 = por %p110_p10, %p52_p3  ;;  %s130_s25 = sand.u32 1, %s572_s11  }
  0x12   : > { %s393_s26 = sshll.u32 %s130_s25, 3  ;;  %s394_s27 = sshll.u32 %s580_s13, 7 }
  0x13   : > { %s800_s24 = scalar_select %p662_p11, 1, 0 }
  0x14   : > { %s673_s30 = scalar_lea.hbm %s793_s0, %s394_s27  ;;  %s134_s3 = scalar_lea.vmem [#allocation4], %s393_s26 }
  0x15   : > { %s142_s4 = sshll.u32 %s134_s3, 4  ;;  %p679_p0 = pnand %p417_p13, %p645_p4  ;;  %s675_s4 = int_to_ptr.vmem [resolvable:$true] %s142_s4 }
  0x16   : > { %s131_s6 = scalar_lea.sflag [#allocation5], %s130_s25  ;;  %s472_s7 = scalar_lea.hbm %s673_s30, 128 }
  0x17   : > { %p473_p3 = scmp.ne.s32.totalorder %s673_s30, %s472_s7  ;;  %p474_p5 = pneg %p679_p0 }
  0x18   : > { %s477_s16 = scalar_lea.hbm %s793_s0, 256  ;;  %p478_p4 = scmp.lt.u32.totalorder %s673_s30, %s793_s0 }
  0x19   : > { %p475_p6 = pnand %p474_p5, %p473_p3  ;;  %p479_p10 = scmp.lt.u32.totalorder %s477_s16, %s472_s7 }
  0x1a   : > { %p481_p12 = scmp.lt.u32.totalorder %s472_s7, %s673_s30 }
  0x1b   : > { %p476_p7 = pneg %p475_p6  ;;  %p480_p13 = por %p479_p10, %p478_p4 }
  0x1d   : > { %p482_p1 = por %p481_p12, %p480_p13 }
  0x1f   : > { %p483_p2 = pnand %p482_p1, %p476_p7 }
  0x21   : > { %486 = shalt.err (!%p483_p2)
}
  0x22   : > { %s487_s20 = scalar_lea.vmem %s675_s4, 128  ;;  %s586_s25 = smov [#allocation4]  }
  0x23   : > { %p488_p3 = scmp.ne.s32.totalorder %s675_s4, %s487_s20  ;;  %s492_s26 = sshll.u32 %s586_s25, 4  ;;  %s493_s26 = int_to_ptr.vmem [resolvable:$false] %s492_s26 }
  0x24   : > { %s494_s27 = scalar_lea.vmem %s493_s26, 256  ;;  %p495_p9 = scmp.lt.s32.totalorder %s675_s4, %s493_s26 }
  0x25   : > { %p490_p6 = pnand %p488_p3, %p474_p5  ;;  %p496_p4 = scmp.lt.s32.totalorder %s494_s27, %s487_s20 }
  0x27   : > { %p491_p11 = pneg %p490_p6  ;;  %p497_p10 = por %p496_p4, %p495_p9 }
  0x29   : > { %p498_p12 = pnand %p497_p10, %p491_p11 }
  0x2b   : > { %501 = shalt.err (!%p498_p12)
}
  0x2c   : > { %412 = dma.hbm_to_vmem [thread:$0]  (!%p679_p0), %s673_s30, 128, %s675_s4, %s131_s6  }
  0x2d   : > { %p802_p1 = scmp.lt.s32.totalorder %s584_s14, 3  ;;  %p803_p2 = scmp.ge.s32.totalorder %s584_s14, 1 }
  0x2f   : > { %p157_p5 = pnand %p803_p2, %p802_p1 }
  0x30   : > { %s715_s28 = sand.u32 (!%p157_p5), 1, %s568_s10  }
  0x31   : > { %160 = sbr.rel (%p157_p5) target bundleno = 353 (0x161), region = 28  ;;  %s396_s29 = sshll.u32 (!%p157_p5), %s715_s28, 3 }
  0x32   : > { %s163_s3 = scalar_lea.sflag (!%p157_p5), [#allocation5], %s715_s28  ;;  %s166_s7 = scalar_lea.vmem (!%p157_p5), [#allocation4], %s396_s29 }
  0x38   : > { %555 = dma.done.wait (%p651_p8), %s163_s3, 128  }
  0x39   : > { %557 = vsyncadd (%p651_p8), %s163_s3, 4294967168  ;;  %p192_p9 = scmp.lt.s32.totalorder %s576_s12, 1  ;;  %vm202_vm0 = vcmask 122880   ;;  %v587_v0 = vmov 0.0   ;;  %vm207_vm1 = vcmask 130048   ;;  %v205_v1 = vld [vmem:[%s166_s7] sm:$0xff]  ;;  %v228_v11 = vlaneseq }
  0x3a   : > { %203 = vst.msk [vmem:[#allocation2] sm:$0x1] %vm202_vm0, %v587_v0  ;;  %204 = vst.msk [vmem:[#allocation3] sm:$0x1] %vm202_vm0, %v587_v0  ;;  %v208_v3 = vsel %vm207_vm1, %v205_v1, -inf  ;;  %s398_s21 = sshll.u32 %s576_s12, 4 }
  0x3b   : > { %s193_s30 = scalar_select %p192_p9, %s576_s12, 1  ;;  %v209_v5 = vrot.slane %v208_v3, 4  ;;  %v229_v14 = vshrl.u32 %v228_v11, 7  ;;  %v281_v60 = vand.u32 127, %v228_v11 }
  0x3c   : > { %s191_s15 = scalar_lea.vmem [#allocation7], %s715_s28  ;;  %s744_s25 = scalar_lea.hbm %s795_s2, %s398_s21 }
  0x3d   : > { %s197_s6 = scalar_lea.vmem %s794_s1, %s193_s30  ;;  %v210_v8 = vmax.f32 %v208_v3, %v209_v5  ;;  %v232_v17 = vsub.s32 0, %v229_v14  ;;  %vm283_vm4 = vcmp.eq.s32.totalorder %v281_v60, 1  ;;  %s302_s16 = sshll.u32 %s191_s15, 4  ;;  %vm282_vm5 = vcmp.eq.s32.totalorder %v281_v60, 0  ;;  %s746_s16 = int_to_ptr.vmem [resolvable:$true] %s302_s16 }
  0x3e   : > { %v206_v2 = vld [vmem:[%s197_s6] sm:$0x1]  ;;  %s290_s12 = scalar_lea.sflag [#allocation6], %s715_s28  ;;  %s502_s26 = scalar_lea.vmem %s746_s16, 16 }
  0x3f   : > { %vm244_vm2 = vcmp.ne.s32.totalorder %v206_v2, 4294967196  ;;  %v211_v9 = vrot.slane %v210_v8, 2  ;;  %v233_v18 = vrot.slane %v206_v2, %v232_v17  ;;  %p503_p8 = scmp.ne.s32.totalorder %s746_s16, %s502_s26  ;;  %p804_p11 = scmp.ne.s32.totalorder %s799_s22, 0 }
  0x40   : > { %v397_v6 = vsel %vm244_vm2, 1.0, %v587_v0  ;;  %s588_s27 = smov [#allocation7]  }
  0x41   : > { %v250_v4 = vld [vmem:[#allocation3] sm:$0x1]  ;;  %v212_v10 = vmax.f32 %v210_v8, %v211_v9  ;;  %vm234_vm3 = vcmp.eq.s32.totalorder %v229_v14, %v233_v18  ;;  %v245_v39 = vld [vmem:[#allocation2] sm:$0x1]  ;;  %p504_p0 = pnand %p503_p8, %p804_p11  ;;  %s506_s29 = sshll.u32 %s588_s27, 4  ;;  %s507_s29 = int_to_ptr.vmem [resolvable:$false] %s506_s29 }
  0x42   : > { %v253_v7 = vadd.f32 %v397_v6, %v250_v4  ;;  %v235_v19 = vsel %vm234_vm3, %v205_v1, 0.0  ;;  %s508_s3 = scalar_lea.vmem %s507_s29, 32  ;;  %p509_p13 = scmp.lt.s32.totalorder %s746_s16, %s507_s29 }
  0x43   : > { %v213_v12 = vrot.slane %v212_v10, 1  ;;  %v236_v23 = vsel %vm207_vm1, %v235_v19, 0.0  ;;  %p505_p7 = pneg %p504_p0  ;;  %p510_p3 = scmp.lt.s32.totalorder %s508_s3, %s502_s26 }
  0x44   : > { %254 = vst.msk [vmem:[#allocation3] sm:$0x1] %vm202_vm0, %v253_v7  ;;  %v237_v25 = vrot.slane %v236_v23, 4 }
  0x45   : > { %v214_v13 = vmax.f32 %v212_v10, %v213_v12  ;;  %p511_p6 = por %p510_p3, %p509_p13 }
  0x46   : > { %v238_v28 = vadd.f32 %v237_v25, %v236_v23 }
  0x47   : > { %v215_v15 = vsub.f32 %v205_v1, %v214_v13  ;;  %p512_p4 = pnand %p511_p6, %p505_p7 }
  0x48   : > { %v239_v31 = vrot.slane %v238_v28, 2 }
  0x49   : > { %v216_v16 = vmul.f32 1.442695, %v215_v15 }
  0x4a   : > { %v240_v32 = vadd.f32 %v239_v31, %v238_v28 }
  0x4b   : > { %468 = vpow2.f32 %v216_v16  ;;  %v269_v43 = vld [vmem:[#allocation3] sm:$0x1] }
  0x4c   : > { %v241_v33 = vrot.slane %v240_v32, 1  ;;  %v270_v45 = vsel %vm202_vm0, %v269_v43, 0.0 }
  0x4e   : > { %v242_v36 = vadd.f32 %v241_v33, %v240_v32 }
  0x55   : > { %v469_v20 = vpop.eup %468 }
  0x56   : > { %v218_v21 = vsel %vm207_vm1, %v469_v20, 0.0 }
  0x57   : > { %v219_v22 = vrot.slane %v218_v21, 4 }
  0x59   : > { %v220_v24 = vadd.f32 %v219_v22, %v218_v21 }
  0x5b   : > { %v221_v26 = vrot.slane %v220_v24, 2 }
  0x5d   : > { %v222_v27 = vadd.f32 %v221_v26, %v220_v24 }
  0x5f   : > { %v223_v29 = vrot.slane %v222_v27, 1 }
  0x61   : > { %v224_v30 = vadd.f32 %v223_v29, %v222_v27 }
  0x63   : > { %470 = vlog2.f32 %v224_v30 }
  0x6d   : > { %v471_v34 = vpop.eup %470 }
  0x6e   : > { %v226_v35 = vmul.f32 0.6931472, %v471_v34 }
  0x70   : > { %v227_v37 = vadd.f32 %v226_v35, %v214_v13 }
  0x72   : > { %v243_v38 = vsub.f32 %v227_v37, %v242_v36 }
  0x74   : > { %v246_v40 = vsel %vm244_vm2, %v243_v38, 0.0 }
  0x75   : > { %v247_v41 = vadd.f32 %v246_v40, %v245_v39 }
  0x77   : > { %249 = vst.msk [vmem:[#allocation2] sm:$0x1] %vm202_vm0, %v247_v41 }
  0x7e   : > { %v258_v42 = vld [vmem:[#allocation2] sm:$0x1] }
  0x7f   : > { %v259_v44 = vsel %vm202_vm0, %v258_v42, 0.0 }
  0x80   : > { %260 = vadd.xlane.f32.xlu0 %v259_v44 }
  0x84   : > { %271 = vadd.xlane.f32.xlu0 %v270_v45 }
 0x10d   : > { %v261_v46 = vpop.xlane.xlu0 %260 }
 0x10e   : > { %v262_v47 = vrot.slane %v261_v46, 4 }
 0x110   : > { %v263_v48 = vadd.f32 %v262_v47, %v261_v46 }
 0x111   : > { %v272_v49 = vpop.xlane.xlu0 %271 }
 0x112   : > { %v264_v50 = vrot.slane %v263_v48, 2  ;;  %v273_v51 = vrot.slane %v272_v49, 4 }
 0x114   : > { %v274_v52 = vadd.f32 %v273_v51, %v272_v49  ;;  %v265_v53 = vadd.f32 %v264_v50, %v263_v48 }
 0x116   : > { %v275_v54 = vrot.slane %v274_v52, 2  ;;  %v266_v55 = vrot.slane %v265_v53, 1 }
 0x118   : > { %v276_v56 = vadd.f32 %v275_v54, %v274_v52  ;;  %v267_v57 = vadd.f32 %v266_v55, %v265_v53 }
 0x11a   : > { %401 = vpush %v267_v57  ;;  %v277_v58 = vrot.slane %v276_v56, 1 }
 0x11c   : > { %v278_v59 = vadd.f32 %v277_v58, %v276_v56 }
 0x11e   : > { %403 = vpush %v278_v59 }
 0x14b   : > { %s402_s8 = spop %401 }
 0x14c   : > { %v286_v62 = vstv %s402_s8 }
 0x14f   : > { %s404_s18 = spop %403 }
 0x150   : > { %v284_v61 = vstv %s404_s18 }
 0x151   : > { %v285_v63 = vsel %vm283_vm4, %v284_v61, 0.0 }
 0x152   : > { %v287_v0 = vsel %vm282_vm5, %v286_v62, %v285_v63 }
 0x153   : > { %288 = vst [vmem:[%s191_s15] sm:$0x1] %v287_v0 }
 0x154   : > { %515 = shalt.err (!%p512_p4)
}
 0x155   : > { %s516_s28 = scalar_lea.hbm %s744_s25, 16  ;;  %s520_s4 = scalar_lea.hbm %s795_s2, 32 }
 0x156   : > { %p517_p10 = scmp.ne.s32.totalorder %s744_s25, %s516_s28  ;;  %p521_p2 = scmp.lt.u32.totalorder %s744_s25, %s795_s2 }
 0x157   : > { %p522_p5 = scmp.lt.u32.totalorder %s520_s4, %s516_s28  ;;  %p524_p8 = scmp.lt.u32.totalorder %s516_s28, %s744_s25 }
 0x158   : > { %p518_p12 = pnand %p517_p10, %p804_p11 }
 0x159   : > { %p523_p9 = por %p522_p5, %p521_p2 }
 0x15a   : > { %p519_p1 = pneg %p518_p12 }
 0x15b   : > { %p525_p0 = por %p524_p8, %p523_p9 }
 0x15d   : > { %p526_p7 = pnand %p525_p0, %p519_p1 }
 0x15f   : > { %529 = shalt.err (!%p526_p7)
}
 0x160   : > { %407 = dma.vmem_to_hbm [thread:$0]  (%p804_p11), %s746_s16, 16, %s744_s25, %s290_s12  }
 0x161 PF: > { %s314_s21 = sand.u32 1, %s564_s9   ;;  %p805_p13 = scmp.ne.s32.totalorder %s800_s24, 0 }
 0x162   : > { %p806_p3 = scmp.ge.s32.totalorder %s584_s14, 2  ;;  %s315_s8 = scalar_lea.sflag [#allocation6], %s314_s21 }
 0x164   : > { %p414_p6 = pnand %p806_p3, %p805_p13 }
 0x166   : > { %559 = dma.done.wait (!%p414_p6), %s315_s8, 16  }
 0x167   : > { %561 = vsyncadd (!%p414_p6), %s315_s8, 4294967280  ;;  %s18_s14 = sadd.s32 1, %s584_s14   ;;  %s807_s9 = smov %s568_s10 }
 0x168   : > { %p15_p4 = scmp.ge.s32.totalorder %s18_s14, 4   ;;  %s808_s10 = smov %s572_s11 }
 0x169   : > { %s809_s11 = smov %s660_s23  ;;  %s810_s12 = smov %s580_s13 }
 0x16a   : > { %s811_s13 = smov %s813_s17  ;;  %17 = sbr.rel (!%p15_p4) target bundleno = 6 (0x6), region = 84 }
 0x171   :  { %319 = vsyncpa [#allocation5], 1 }
 0x172   :  { %321 = vsyncpa [#allocation5 + $0x1], 1 }
 0x173   :  { %322 = vsyncpa [#allocation6], 1 }
 0x174   :  { %324 = vsyncpa [#allocation6 + $0x1], 1 }

</bundles_post_ra>
